<compile_context>
chip_gen: v7x
topology: tpu7x:2x2x1
jax: 0.10.0
libtpu: 0.0.40
codegen_flags: <defaults>
</compile_context>

<pallas_src>
import math

import jax
import jax.numpy as jnp
from jax.experimental import pallas as pl
from jax.experimental.pallas import tpu as pltpu


_MASK_VALUE = -1000000.0  # same constant d2l.sequence_mask uses


# ----------------------------------------------------------------------------
# Fused dual dot-product attention kernel
# ----------------------------------------------------------------------------
def _attn_body(q_ref, k_ref, v_ref, o_ref, w_ref, vl):
    ki = pl.program_id(1)

    # Q already carries the 1/sqrt(d) scale (folded into the wrapper's bf16 cast).
    # bf16 x bf16 -> fp32 on the MXU (single pass).
    scores = jnp.einsum("bqd,bkd->bqk", q_ref[...], k_ref[...],
                        preferred_element_type=jnp.float32)      # (TB, Sq, TK) f32

    if vl is not None:
        # Dual masking: query positions >= valid_len are masked.  The tiny
        # (1, Sq, 1) iota broadcasts against the (TB, 1, {1|TK}) valid lengths.
        q_idx = jax.lax.broadcasted_iota(jnp.int32, (1, scores.shape[1], 1), 1)
        scores = jnp.where(q_idx < vl, scores, jnp.float32(_MASK_VALUE))

    # Dual softmax: normalize over the *query* axis (axis=1), all fp32 math.
    m = jnp.max(scores, axis=1, keepdims=True)
    e = jnp.exp(scores - m)
    s = jnp.sum(e, axis=1, keepdims=True)
    w = e * pl.reciprocal(s, approx=True)                         # (TB, Sq, TK) f32

    w_ref[...] = w.astype(w_ref.dtype)

    # TODO(synk): dropout(attn_w) skipped (eval-mode identity).
    av = jnp.einsum("bqk,bkd->bqd", w.astype(v_ref.dtype), v_ref[...],
                    preferred_element_type=jnp.float32)           # (TB, Sq, Dv) f32

    # o_ref's block index is constant across ki -> it stays VMEM-resident for the
    # whole key-axis reduction; accumulate directly into it (no scratch).
    @pl.when(ki == 0)
    def _():
        o_ref[...] = av

    @pl.when(ki > 0)
    def _():
        o_ref[...] += av


def _attn_kernel_masked(q_ref, k_ref, v_ref, vl_ref, o_ref, w_ref):
    _attn_body(q_ref, k_ref, v_ref, o_ref, w_ref, vl_ref[...])


def _attn_kernel_nomask(q_ref, k_ref, v_ref, o_ref, w_ref):
    _attn_body(q_ref, k_ref, v_ref, o_ref, w_ref, None)


# ----------------------------------------------------------------------------
# Wrapper
# ----------------------------------------------------------------------------
def dot_product_attention_d(queries, keys, values, valid_lens=None, *,
                            block_b=8, block_k=None,
                            attn_w_dtype=jnp.float32,
                            vmem_limit_bytes=None):
    """queries: (B, Sq, D), keys: (B, Sk, D), values: (B, Sk, Dv).

    valid_lens: None, (B,) int, or (B, Sk) int — masks the *query* axis (dual
    attention).  Returns (attn_score (B, Sq, Dv) f32, attn_w (B, Sq, Sk)).
    """
    B, Sq, D = queries.shape
    Bk, Sk, Dk = keys.shape
    Bv, Skv, Dv = values.shape
    assert (B, D) == (Bk, Dk) and (B, Sk) == (Bv, Skv)

    # bf16 MXU operands (single-pass MXU; half the Q/K/V HBM + VMEM bytes).
    # 1/sqrt(d) is folded into the Q cast, which is required anyway.
    scale = 1.0 / math.sqrt(D)
    q = (queries.astype(jnp.float32) * scale).astype(jnp.bfloat16)
    k = keys.astype(jnp.bfloat16)
    v = values.astype(jnp.bfloat16)

    # Pad the key axis to a multiple of 128 so attn_w stores stay lane-dense.
    # Zero-padded key columns contribute 0 to attn@V and are sliced off afterwards.
    Skp = -(-Sk // 128) * 128
    pad_k = Skp - Sk
    if pad_k:
        k = jnp.pad(k, ((0, 0), (0, pad_k), (0, 0)))
        v = jnp.pad(v, ((0, 0), (0, pad_k), (0, 0)))

    # Valid lengths: (B,1,1) when per-batch, (B,1,Skp) when per-(batch, key).
    if valid_lens is None:
        vl3 = None
    elif valid_lens.ndim == 1:
        vl3 = valid_lens.astype(jnp.int32).reshape(B, 1, 1)
    else:
        vl3 = valid_lens.astype(jnp.int32).reshape(B, 1, Sk)
        if pad_k:
            vl3 = jnp.pad(vl3, ((0, 0), (0, 0), (0, pad_k)), constant_values=Sq)

    # Batch tile: keep >=2 steps on the "parallel" batch axis when B allows
    # (v7x has 2 TensorCores that shard the parallel grid axis).
    TB = max(1, min(block_b, B if B < 2 else B // 2))
    pad_b = (-B) % TB
    if pad_b:
        q = jnp.pad(q, ((0, pad_b), (0, 0), (0, 0)))
        k = jnp.pad(k, ((0, pad_b), (0, 0), (0, 0)))
        v = jnp.pad(v, ((0, pad_b), (0, 0), (0, 0)))
        if vl3 is not None:
            vl3 = jnp.pad(vl3, ((0, pad_b), (0, 0), (0, 0)), constant_values=Sq)
    Bp = B + pad_b

    # Key tile: largest multiple of 128 dividing Skp, capped at 512 (reduction
    # axis of attn@V -> accumulated into the resident output block).
    if block_k is None:
        TK = min(Skp, 512)
        while Skp % TK:
            TK -= 128
    else:
        TK = block_k
        assert Skp % TK == 0

    grid = (Bp // TB, Skp // TK)

    in_specs = [
        pl.BlockSpec((TB, Sq, D), lambda bi, ki: (bi, 0, 0)),
        pl.BlockSpec((TB, TK, D), lambda bi, ki: (bi, ki, 0)),
        pl.BlockSpec((TB, TK, Dv), lambda bi, ki: (bi, ki, 0)),
    ]
    args = [q, k, v]
    if vl3 is None:
        kernel = _attn_kernel_nomask
    else:
        kernel = _attn_kernel_masked
        if vl3.shape[-1] == 1:
            in_specs.append(pl.BlockSpec((TB, 1, 1), lambda bi, ki: (bi, 0, 0)))
        else:
            in_specs.append(pl.BlockSpec((TB, 1, TK), lambda bi, ki: (bi, 0, ki)))
        args.append(vl3)

    out_specs = [
        pl.BlockSpec((TB, Sq, Dv), lambda bi, ki: (bi, 0, 0)),   # accumulated over ki
        pl.BlockSpec((TB, Sq, TK), lambda bi, ki: (bi, 0, ki)),  # lane-dense weights
    ]

    # Rough per-step VMEM footprint; raise the scoped limit only when needed and
    # keep it v7x-safe (<= 48 MiB of the 64 MiB physical VMEM).
    blk_bytes = (TB * Sq * D * 2 + TB * TK * D * 2 + TB * TK * Dv * 2
                 + TB * Sq * TK * jnp.dtype(attn_w_dtype).itemsize
                 + TB * Sq * Dv * 4)
    cp_kwargs = dict(dimension_semantics=("parallel", "arbitrary"))
    if vmem_limit_bytes is None and 3 * blk_bytes > (12 << 20):
        vmem_limit_bytes = min(4 * blk_bytes, 48 << 20)
    if vmem_limit_bytes is not None:
        cp_kwargs["vmem_limit_bytes"] = int(vmem_limit_bytes)

    attn_score, attn_w = pl.pallas_call(
        kernel,
        out_shape=(
            jax.ShapeDtypeStruct((Bp, Sq, Dv), jnp.float32),
            jax.ShapeDtypeStruct((Bp, Sq, Skp), attn_w_dtype),
        ),
        grid_spec=pltpu.PrefetchScalarGridSpec(
            num_scalar_prefetch=0,
            grid=grid,
            in_specs=in_specs,
            out_specs=out_specs,
        ),
        compiler_params=pltpu.CompilerParams(**cp_kwargs),
    )(*args)

    if pad_b:
        attn_score = attn_score[:B]
        attn_w = attn_w[:B]
    if pad_k:
        attn_w = attn_w[:, :, :Sk]
    return attn_score, attn_w


# ----------------------------------------------------------------------------
# Pure-JAX fp32 reference mirroring the PyTorch module literally
# ----------------------------------------------------------------------------
def reference_dual_attention(queries, keys, values, valid_lens=None):
    B, Sq, d = queries.shape
    hp = jax.lax.Precision.HIGHEST
    scores = jnp.einsum("bqd,bkd->bqk", queries, keys, precision=hp) / math.sqrt(d)
    scores_t = jnp.transpose(scores, (0, 2, 1))        # (B, Sk, Sq)
    if valid_lens is not None:
        if valid_lens.ndim == 1:
            vl = jnp.repeat(valid_lens.astype(jnp.int32), scores_t.shape[1])
        else:
            vl = valid_lens.reshape(-1).astype(jnp.int32)
        flat = scores_t.reshape(-1, Sq)
        col = jnp.arange(Sq)[None, :]
        flat = jnp.where(col < vl[:, None], flat, _MASK_VALUE)
        scores_t = flat.reshape(scores_t.shape)
    w_t = jax.nn.softmax(scores_t, axis=-1)
    attn_w = jnp.transpose(w_t, (0, 2, 1))             # (B, Sq, Sk)
    attn_score = jnp.einsum("bqk,bkd->bqd", attn_w, values, precision=hp)
    return attn_score, attn_w


# ----------------------------------------------------------------------------
if __name__ == "__main__":
    # Small shapes consistent with the module's forward; Sk multiple of 128
    # (lane-dense weights), Sq multiple of 8.
    B, Sq, Sk, D, Dv = 4, 64, 128, 32, 64

    root = jax.random.PRNGKey(0)
    kq, kk, kv = jax.random.split(root, 3)
    q = jax.random.normal(kq, (B, Sq, D), dtype=jnp.float32)
    k = jax.random.normal(kk, (B, Sk, D), dtype=jnp.float32)
    v = jax.random.normal(kv, (B, Sk, Dv), dtype=jnp.float32)

    # Per-batch valid lengths along the *query* axis (dual masking).
    valid_lens = jnp.array([17, 64, 33, 48], dtype=jnp.int32)

    out, attn_w = dot_product_attention_d(q, k, v, valid_lens)
    out = jax.block_until_ready(out)
    attn_w = jax.block_until_ready(attn_w)

    ref_out, ref_w = reference_dual_attention(q, k, v, valid_lens)

    assert out.shape == (B, Sq, Dv) and attn_w.shape == (B, Sq, Sk)
    # bf16 MXU operands: weights agree with the fp32 reference at the ~1e-2 level,
    # and attn@V accumulates that error over the Sk-long contraction.
    assert jnp.allclose(attn_w, ref_w, atol=2e-2, rtol=2e-2), "attn_w mismatch"
    assert jnp.allclose(out, ref_out, atol=7e-2, rtol=2e-2), "attn_score mismatch"

    # valid_lens=None path (specialized no-mask kernel).
    out2, attn_w2 = dot_product_attention_d(q, k, v, None)
    out2 = jax.block_until_ready(out2)
    ref_out2, ref_w2 = reference_dual_attention(q, k, v, None)
    assert jnp.allclose(attn_w2, ref_w2, atol=2e-2, rtol=2e-2), "attn_w (no mask) mismatch"
    assert jnp.allclose(out2, ref_out2, atol=7e-2, rtol=2e-2), "attn_score (no mask) mismatch"

    print("KERNEL_OK")
</pallas_src>

<mosaic_0001>
module attributes {stable_mosaic.version = 11 : i64} {
  func.func @_attn_kernel_masked(%arg0: i32, %arg1: i32, %arg2: memref<2x64x32xbf16, #tpu.memory_space<vmem>>, %arg3: memref<2x128x32xbf16, #tpu.memory_space<vmem>>, %arg4: memref<2x128x64xbf16, #tpu.memory_space<vmem>>, %arg5: memref<2x1x1xi32, #tpu.memory_space<vmem>>, %arg6: memref<2x64x64xf32, #tpu.memory_space<vmem>>, %arg7: memref<2x64x128xf32, #tpu.memory_space<vmem>>) attributes {dimension_semantics = [#tpu.dimension_semantics<parallel>, #tpu.dimension_semantics<arbitrary>], iteration_bounds = array<i64: 2, 1>, scalar_prefetch = 0 : i64, scratch_operands = 0 : i64, tpu.core_type = #tpu.core_type<tc>, window_params = [{transform_indices = @transform_0, window_bounds = array<i64: 2, 64, 32>}, {transform_indices = @transform_1, window_bounds = array<i64: 2, 128, 32>}, {transform_indices = @transform_2, window_bounds = array<i64: 2, 128, 64>}, {transform_indices = @transform_3, window_bounds = array<i64: 2, 1, 1>}, {transform_indices = @transform_4, window_bounds = array<i64: 2, 64, 64>}, {transform_indices = @transform_5, window_bounds = array<i64: 2, 64, 128>}]} {
    %c0 = arith.constant 0 : index
    %c0_0 = arith.constant 0 : index
    %c0_1 = arith.constant 0 : index
    %0 = vector.load %arg5[%c0, %c0_0, %c0_1] : memref<2x1x1xi32, #tpu.memory_space<vmem>>, vector<2x1x1xi32>
    %c0_2 = arith.constant 0 : index
    %c0_3 = arith.constant 0 : index
    %c0_4 = arith.constant 0 : index
    %1 = vector.load %arg2[%c0_2, %c0_3, %c0_4] : memref<2x64x32xbf16, #tpu.memory_space<vmem>>, vector<2x64x32xbf16>
    %c0_5 = arith.constant 0 : index
    %c0_6 = arith.constant 0 : index
    %c0_7 = arith.constant 0 : index
    %2 = vector.load %arg3[%c0_5, %c0_6, %c0_7] : memref<2x128x32xbf16, #tpu.memory_space<vmem>>, vector<2x128x32xbf16>
    "tpu.trace_start"() <{level = 10 : i32, message = "bqd,bkd->bqk"}> : () -> ()
    %cst = arith.constant dense<0.000000e+00> : vector<2x64x128xf32>
    %3 = tpu.matmul %1, %2, %cst {dimension_numbers = #tpu.dot_dimension_numbers<[2], [2], [1], [1], [0, 0, 0, 1, 1, 1], [0], [0]>} : vector<2x64x32xbf16>, vector<2x128x32xbf16>, vector<2x64x128xf32> -> vector<2x64x128xf32>
    "tpu.trace_stop"() : () -> ()
    %4 = tpu.iota {dimensions = array<i32: 1>} : vector<1x64x1xi32>
    %5 = vector.broadcast %4 : vector<1x64x1xi32> to vector<2x64x1xi32>
    %6 = vector.broadcast %0 : vector<2x1x1xi32> to vector<2x64x1xi32>
    %7 = arith.cmpi slt, %5, %6 : vector<2x64x1xi32>
    %cst_8 = arith.constant -1.000000e+06 : f32
    %8 = vector.shape_cast %7 : vector<2x64x1xi1> to vector<2x64x1xi1>
    %9 = vector.broadcast %8 : vector<2x64x1xi1> to vector<2x64x128xi1>
    %10 = vector.broadcast %cst_8 : f32 to vector<2x64x128xf32>
    %11 = arith.select %9, %3, %10 : vector<2x64x128xi1>, vector<2x64x128xf32>
    %cst_9 = arith.constant dense<0xFF800000> : vector<2x128xf32>
    %12 = vector.multi_reduction <maximumf>, %11, %cst_9 [1] : vector<2x64x128xf32> to vector<2x128xf32>
    %13 = vector.shape_cast %12 : vector<2x128xf32> to vector<2x1x128xf32>
    %14 = vector.broadcast %13 : vector<2x1x128xf32> to vector<2x64x128xf32>
    %15 = arith.subf %11, %14 : vector<2x64x128xf32>
    %16 = math.exp %15 : vector<2x64x128xf32>
    %cst_10 = arith.constant dense<0.000000e+00> : vector<2x128xf32>
    %17 = vector.multi_reduction <add>, %16, %cst_10 [1] : vector<2x64x128xf32> to vector<2x128xf32>
    %18 = vector.shape_cast %17 : vector<2x128xf32> to vector<2x1x128xf32>
    %19 = tpu.reciprocal %18 {approx = true} : vector<2x1x128xf32> -> vector<2x1x128xf32>
    %20 = vector.broadcast %19 : vector<2x1x128xf32> to vector<2x64x128xf32>
    %21 = arith.mulf %16, %20 : vector<2x64x128xf32>
    %c0_11 = arith.constant 0 : index
    %c0_12 = arith.constant 0 : index
    %c0_13 = arith.constant 0 : index
    %22 = vector.load %arg7[%c0_11, %c0_12, %c0_13] : memref<2x64x128xf32, #tpu.memory_space<vmem>>, vector<2x64x128xf32>
    tpu.vector_store %arg7[%c0_11, %c0_12, %c0_13], %21 {strides = array<i32>} : memref<2x64x128xf32, #tpu.memory_space<vmem>>, vector<2x64x128xf32>,
    %23 = arith.truncf %21 : vector<2x64x128xf32> to vector<2x64x128xbf16>
    %c0_14 = arith.constant 0 : index
    %c0_15 = arith.constant 0 : index
    %c0_16 = arith.constant 0 : index
    %24 = vector.load %arg4[%c0_14, %c0_15, %c0_16] : memref<2x128x64xbf16, #tpu.memory_space<vmem>>, vector<2x128x64xbf16>
    "tpu.trace_start"() <{level = 10 : i32, message = "bqk,bkd->bqd"}> : () -> ()
    %cst_17 = arith.constant dense<0.000000e+00> : vector<2x64x64xf32>
    %25 = tpu.matmul %23, %24, %cst_17 {dimension_numbers = #tpu.dot_dimension_numbers<[2], [1], [1], [2], [0, 0, 0, 1, 1, 2], [0], [0]>} : vector<2x64x128xbf16>, vector<2x128x64xbf16>, vector<2x64x64xf32> -> vector<2x64x64xf32>
    %c0_i32 = arith.constant 0 : i32
    "tpu.trace_stop"() : () -> ()
    %26 = arith.cmpi eq, %arg1, %c0_i32 : i32
    %27 = arith.extui %26 : i1 to i32
    %c0_i32_18 = arith.constant 0 : i32
    %28 = arith.cmpi ne, %27, %c0_i32_18 : i32
    scf.if %28 {
      %c0_21 = arith.constant 0 : index
      %c0_22 = arith.constant 0 : index
      %c0_23 = arith.constant 0 : index
      %32 = vector.load %arg6[%c0_21, %c0_22, %c0_23] : memref<2x64x64xf32, #tpu.memory_space<vmem>>, vector<2x64x64xf32>
      tpu.vector_store %arg6[%c0_21, %c0_22, %c0_23], %25 {strides = array<i32>} : memref<2x64x64xf32, #tpu.memory_space<vmem>>, vector<2x64x64xf32>,
    } else {
    }
    %c0_i32_19 = arith.constant 0 : i32
    %29 = arith.cmpi sgt, %arg1, %c0_i32_19 : i32
    %30 = arith.extui %29 : i1 to i32
    %c0_i32_20 = arith.constant 0 : i32
    %31 = arith.cmpi ne, %30, %c0_i32_20 : i32
    scf.if %31 {
      %c0_21 = arith.constant 0 : index
      %c0_22 = arith.constant 0 : index
      %c0_23 = arith.constant 0 : index
      %32 = vector.load %arg6[%c0_21, %c0_22, %c0_23] : memref<2x64x64xf32, #tpu.memory_space<vmem>>, vector<2x64x64xf32>
      %33 = arith.addf %32, %25 : vector<2x64x64xf32>
      %c0_24 = arith.constant 0 : index
      %c0_25 = arith.constant 0 : index
      %c0_26 = arith.constant 0 : index
      %34 = vector.load %arg6[%c0_24, %c0_25, %c0_26] : memref<2x64x64xf32, #tpu.memory_space<vmem>>, vector<2x64x64xf32>
      tpu.vector_store %arg6[%c0_24, %c0_25, %c0_26], %33 {strides = array<i32>} : memref<2x64x64xf32, #tpu.memory_space<vmem>>, vector<2x64x64xf32>,
    } else {
    }
    return
  }
  func.func @transform_0(%arg0: i32, %arg1: i32) -> (i32, i32, i32) {
    %c0_i32 = arith.constant 0 : i32
    %c0_i32_0 = arith.constant 0 : i32
    %c0_i32_1 = arith.constant 0 : i32
    return %arg0, %c0_i32, %c0_i32_0 : i32, i32, i32
  }
  func.func @transform_1(%arg0: i32, %arg1: i32) -> (i32, i32, i32) {
    %c0_i32 = arith.constant 0 : i32
    %c0_i32_0 = arith.constant 0 : i32
    return %arg0, %arg1, %c0_i32 : i32, i32, i32
  }
  func.func @transform_2(%arg0: i32, %arg1: i32) -> (i32, i32, i32) {
    %c0_i32 = arith.constant 0 : i32
    %c0_i32_0 = arith.constant 0 : i32
    return %arg0, %arg1, %c0_i32 : i32, i32, i32
  }
  func.func @transform_3(%arg0: i32, %arg1: i32) -> (i32, i32, i32) {
    %c0_i32 = arith.constant 0 : i32
    %c0_i32_0 = arith.constant 0 : i32
    %c0_i32_1 = arith.constant 0 : i32
    return %arg0, %c0_i32, %c0_i32_0 : i32, i32, i32
  }
  func.func @transform_4(%arg0: i32, %arg1: i32) -> (i32, i32, i32) {
    %c0_i32 = arith.constant 0 : i32
    %c0_i32_0 = arith.constant 0 : i32
    %c0_i32_1 = arith.constant 0 : i32
    return %arg0, %c0_i32, %c0_i32_0 : i32, i32, i32
  }
  func.func @transform_5(%arg0: i32, %arg1: i32) -> (i32, i32, i32) {
    %c0_i32 = arith.constant 0 : i32
    %c0_i32_0 = arith.constant 0 : i32
    return %arg0, %c0_i32, %arg1 : i32, i32, i32
  }
}

</mosaic_0001>

<bundles_post_ra>
// kernel: tpu_custom_call.1
= control target key start
LH: loop header
LB: loop body
LE: loop exit
PB: predicated region body
PF: predicated region fallthrough
CT: control target
= control target key end

     0   :  { %11 = vsyncpa [#allocation3], 0  ;;  %s2479_s0 = inlined_call_operand.vmem [shape: bf16[4,64,32], index: 0, kind: input, shape index: {}]   ;;  %s2480_s1 = inlined_call_operand.vmem [shape: bf16[4,128,32], index: 1, kind: input, shape index: {}]   ;;  %s2481_s2 = inlined_call_operand.vmem [shape: bf16[4,128,64], index: 2, kind: input, shape index: {}]   ;;  %s2482_s3 = inlined_call_operand.vmem [shape: s32[4,1,1], index: 3, kind: input, shape index: {}]   ;;  %s2483_s4 = inlined_call_operand.hbm [shape: f32[4,64,64], index: 4, kind: output, shape index: {0}]   ;;  %s2484_s5 = inlined_call_operand.hbm [shape: f32[4,64,128], index: 5, kind: output, shape index: {1}]  }
   0x1   :  { %13 = vsyncpa [#allocation3 + $0x1], 0 }
   0x2   :  { %14 = vsyncpa [#allocation5], 0 }
   0x3   :  { %16 = vsyncpa [#allocation5 + $0x1], 0  ;;  %s2052_s18 = smov 0   ;;  %s2054_s19 = smov 0  }
   0x4   :  { %s2056_s20 = smov 0   ;;  %s2058_s21 = smov 0  }
   0x5   :  { %s2060_s22 = smov 0   ;;  %s2062_s23 = smov 0  }
   0x6 LB: > { %s1520_s24 = sadd.s32 4294967295, %s2015_s23   ;;  %s1521_s25 = sadd.s32 4294967294, %s2015_s23   ;;  %s2015_s23 = sphi %s2062_s23, %s22_s23   ;;  %s2011_s22 = sphi %s2060_s22, %s2491_s22   ;;  %s2007_s21 = sphi %s2058_s21, %s2490_s21   ;;  %s2003_s20 = sphi %s2056_s20, %s2489_s20   ;;  %s1999_s19 = sphi %s2054_s19, %s2488_s19   ;;  %s1995_s18 = sphi %s2052_s18, %s2487_s18  }
   0x7   : > { %s34_s26 = sadd.s32 1, %s2011_s22  ;;  %s149_s27 = sadd.s32 1, %s2003_s20 }
   0x8   : > { %p36_p0 = scmp.ge.s32.totalorder %s34_s26, 2  ;;  %p159_p1 = scmp.ne.s32.totalorder %s2003_s20, %s1999_s19 }
   0x9   : > { %p160_p2 = scmp.eq.s32.totalorder %s1520_s24, 1  ;;  %p165_p3 = scmp.ne.s32.totalorder %s1999_s19, %s1995_s18 }
   0xa   : > { %s2493_s26 = smov (%p36_p0, %s34_s26), 0  ;;  %p166_p5 = scmp.eq.s32.totalorder %s1521_s25, 1 }
   0xb   : > { %p2092_p4 = por %p160_p2, %p159_p1  ;;  %s146_s29 = ssub.s32 %s2011_s22, %s2493_s26 }
   0xc   : > { %p1524_p6 = scmp.ge.s32.totalorder %s2015_s23, 1  ;;  %p147_p7 = scmp.eq.s32.totalorder %s146_s29, 0 }
   0xd   : > { %p2099_p8 = por %p166_p5, %p165_p3  ;;  %p260_p9 = scmp.lt.s32.totalorder %s2015_s23, 3 }
   0xe   : > { %s2105_s6 = scalar_select %p147_p7, %s2003_s20, %s149_s27  }
   0xf   : > { %p261_p10 = pnand %p1524_p6, %p260_p9 }
  0x10   : > { %s1527_s7 = sshll.u32 (!%p261_p10), %s2007_s21, 1  ;;  %v2017_v0 = vmov (!%p261_p10), 0   ;;  %vm467_vm0 = vcmask (!%p261_p10), 261120   ;;  %v730_v11 = vlaneseq (!%p261_p10)  ;;  %s1601_s10 = sshll.u32 (!%p261_p10), %s2007_s21, 11 }
  0x11   : > { %264 = sbr.rel (%p261_p10) target bundleno = 635 (0x27b), region = 36  ;;  %p319_p11 = scmp.lt.s32.totalorder (!%p261_p10), %s1527_s7, 3  ;;  %1828 = vset.pattern.permute.xlu1 (!%p261_p10), %v2017_v0  ;;  %1827 = vset.pattern.permute.xlu0 (!%p261_p10), %v2017_v0 }
  0x12   : > { %v2144_v14 = vshrl.u32 (!%p261_p10), %v730_v11, 7  ;;  %s2352_s13 = scalar_lea.hbm (!%p261_p10), %s2484_s5, %s1601_s10  ;;  %s2018_s17 = smov (!%p261_p10), [#allocation4]  }
  0x14   : > { %v733_v19 = vadd.s32 (!%p261_p10), 16, %v2144_v14  ;;  %v734_v20 = vadd.s32 (!%p261_p10), 24, %v2144_v14  ;;  %v732_v21 = vadd.s32 (!%p261_p10), 8, %v2144_v14  ;;  %v736_v31 = vadd.s32 (!%p261_p10), 40, %v2144_v14 }
  0x15   : > { %v735_v33 = vadd.s32 (!%p261_p10), 32, %v2144_v14  ;;  %v738_v47 = vadd.s32 (!%p261_p10), 56, %v2144_v14  ;;  %v737_v49 = vadd.s32 (!%p261_p10), 48, %v2144_v14 }
  0x18   : > { %s2495_s7 = smov (!%p319_p11, %s1527_s7), 3 }
  0x19   : > { %s1598_s8 = sshll.u32 %s2495_s7, 6  ;;  %s1597_s12 = sshll.u32 %s2495_s7, 5 }
  0x1a   : > { %s2118_s11 = scalar_lea.vmem %s2480_s1, %s1598_s8  ;;  %s2140_s15 = scalar_lea.vmem %s2479_s0, %s1597_s12 }
  0x1b   : > { %v1829_v1 = vld [vmem:[%s2118_s11] sm:$0xff]   ;;  %v1831_v4 = vld [vmem:[%s2118_s11 + $0x8] sm:$0xff]   ;;  %v1833_v8 = vld [vmem:[%s2118_s11 + $0x10] sm:$0xff]   ;;  %s352_s24 = scalar_lea.vmem %s2482_s3, %s2495_s7  ;;  %s2166_s29 = scalar_lea.vmem %s2481_s2, %s1598_s8 }
  0x1c   : > { %v1830_v2 = vld [vmem:[%s2118_s11 + $0x40] sm:$0xff]   ;;  %1748 = vmatprep.subr.msk.bf16.mxu0 %vm467_vm0, %v1829_v1  ;;  %v481_v3 = vsel %vm467_vm0, %v1829_v1, 0  ;;  %v1832_v6 = vld [vmem:[%s2118_s11 + $0x48] sm:$0xff]   ;;  %v484_v7 = vsel %vm467_vm0, %v1831_v4, 0  ;;  %v1834_v10 = vld [vmem:[%s2118_s11 + $0x50] sm:$0xff]   ;;  %v487_v15 = vsel %vm467_vm0, %v1833_v8, 0 }
  0x1d   : > { %1756 = vmatprep.subr.msk.bf16.mxu1 %vm467_vm0, %v1830_v2  ;;  %1653 = vmatpush3.bf16.xpose.msra.mxu0 %v481_v3  ;;  %v642_v5 = vsel %vm467_vm0, %v1830_v2, 0  ;;  %v645_v9 = vsel %vm467_vm0, %v1832_v6, 0  ;;  %v1835_v12 = vld [vmem:[%s2118_s11 + $0x18] sm:$0xff]   ;;  %v1845_v16 = vld [vmem:[%s2140_s15] sm:$0xff]   ;;  %v648_v17 = vsel %vm467_vm0, %v1834_v10, 0  ;;  %v1839_v35 = vld [vmem:[%s2118_s11 + $0x28] sm:$0xff]  }
  0x1e   : > { %1677 = vmatpush3.bf16.xpose.msra.mxu1 %v642_v5  ;;  %1749 = vmatprep.subr.msk.bf16.mxu0 %vm467_vm0, %v1831_v4  ;;  %v1836_v13 = vld [vmem:[%s2118_s11 + $0x58] sm:$0xff]   ;;  %v1846_v18 = vld [vmem:[%s2140_s15 + $0x20] sm:$0xff]   ;;  %v490_v22 = vsel %vm467_vm0, %v1835_v12, 0  ;;  %v1840_v37 = vld [vmem:[%s2118_s11 + $0x68] sm:$0xff]   ;;  %v496_v42 = vsel %vm467_vm0, %v1839_v35, 0  ;;  %s2321_s7 = sand.u32 1, %s1999_s19  }
  0x1f   : > { %1757 = vmatprep.subr.msk.bf16.mxu1 %vm467_vm0, %v1832_v6  ;;  %1668 = vmatprep.mubr.msk.bf16.mxu0 %vm467_vm0, %v1845_v16  ;;  %v1837_v23 = vld [vmem:[%s2118_s11 + $0x20] sm:$0xff]   ;;  %v651_v24 = vsel %vm467_vm0, %v1836_v13, 0  ;;  %v1841_v43 = vld [vmem:[%s2118_s11 + $0x30] sm:$0xff]   ;;  %v657_v45 = vsel %vm467_vm0, %v1840_v37, 0  ;;  %v1843_v53 = vld [vmem:[%s2118_s11 + $0x38] sm:$0xff]   ;;  %s1525_s8 = sshll.u32 %s2321_s7, 7 }
  0x20   : > { %1692 = vmatprep.mubr.msk.bf16.mxu1 %vm467_vm0, %v1846_v18  ;;  %v1838_v25 = vld [vmem:[%s2118_s11 + $0x60] sm:$0xff]   ;;  %v493_v34 = vsel %vm467_vm0, %v1837_v23, 0  ;;  %v1842_v46 = vld [vmem:[%s2118_s11 + $0x70] sm:$0xff]   ;;  %v499_v52 = vsel %vm467_vm0, %v1841_v43, 0  ;;  %v1844_v56 = vld [vmem:[%s2118_s11 + $0x78] sm:$0xff]   ;;  %v502_v60 = vsel %vm467_vm0, %v1843_v53, 0 }
  0x21   : > { %v2172_v26 = vld [vmem:[%s352_s24] ss:$0 sm:$0xff]  ;;  %v2180_v29 = vld [vmem:[%s352_s24 + $0x1] ss:$0 sm:$0xff]  ;;  %v654_v36 = vsel %vm467_vm0, %v1838_v25, 0  ;;  %v660_v55 = vsel %vm467_vm0, %v1842_v46, 0 }
  0x22   : > { %vm749_vm1 = vcmp.lt.s32.totalorder %v733_v19, %v2172_v26  ;;  %vm747_vm2 = vcmp.lt.s32.totalorder %v2144_v14, %v2172_v26  ;;  %vm750_vm3 = vcmp.lt.s32.totalorder %v734_v20, %v2172_v26  ;;  %vm748_vm4 = vcmp.lt.s32.totalorder %v732_v21, %v2172_v26  ;;  %v1847_v62 = vld [vmem:[%s2140_s15 + $0x8] sm:$0xff]   ;;  %v1849_v1 = vld [vmem:[%s2140_s15 + $0x10] sm:$0xff]   ;;  %v1852_v3 = vld [vmem:[%s2140_s15 + $0x38] sm:$0xff]   ;;  %s2326_s9 = scalar_lea.vmem [#allocation4], %s1525_s8  ;;  %s1909_s24 = sshll.u32 %s2018_s17, 4  ;;  %s1910_s24 = int_to_ptr.vmem [resolvable:$false] %s1909_s24 }
  0x23   : > { %v765_v27 = vsel %vm749_vm1, 1, %v2017_v0  ;;  %v763_v28 = vsel %vm747_vm2, 1, %v2017_v0  ;;  %v766_v30 = vsel %vm750_vm3, 1, %v2017_v0  ;;  %vm756_vm5 = vcmp.lt.s32.totalorder %v732_v21, %v2180_v29  ;;  %v1848_v63 = vld [vmem:[%s2140_s15 + $0x28] sm:$0xff]   ;;  %v1850_v2 = vld [vmem:[%s2140_s15 + $0x30] sm:$0xff]   ;;  %v1853_v4 = vld [vmem:[%s2166_s29] sm:$0xff]  }
  0x24   : > { %786 = vperm.xlu1 %1828, %v765_v27   ;;  %780 = vperm.xlu0 %1827, %v763_v28   ;;  %vm755_vm6 = vcmp.lt.s32.totalorder %v2144_v14, %v2180_v29  ;;  %v764_v32 = vsel %vm748_vm4, 1, %v2017_v0  ;;  %vm758_vm7 = vcmp.lt.s32.totalorder %v734_v20, %v2180_v29  ;;  %vm757_vm8 = vcmp.lt.s32.totalorder %v733_v19, %v2180_v29  ;;  %v1854_v5 = vld [vmem:[%s2166_s29 + $0x40] sm:$0xff]   ;;  %v1855_v6 = vld [vmem:[%s2166_s29 + $0x8] sm:$0xff]   ;;  %v1860_v11 = vld [vmem:[%s2166_s29 + $0x58] sm:$0xff]   ;;  %s1371_s14 = sshll.u32 %s2326_s9, 4  ;;  %s1911_s25 = scalar_lea.vmem %s1910_s24, 4096  ;;  %s2355_s14 = int_to_ptr.vmem [resolvable:$true] %s1371_s14 }
  0x25   : > { %1655 = vmatpush3.bf16.xpose.msra.mxu0 %v484_v7  ;;  %v772_v38 = vsel %vm756_vm5, 1, %v2017_v0  ;;  %v771_v39 = vsel %vm755_vm6, 1, %v2017_v0  ;;  %v774_v40 = vsel %vm758_vm7, 1, %v2017_v0  ;;  %v773_v41 = vsel %vm757_vm8, 1, %v2017_v0  ;;  %v1856_v7 = vld [vmem:[%s2166_s29 + $0x48] sm:$0xff]   ;;  %v1865_v16 = vld [vmem:[%s2166_s29 + $0x30] sm:$0xff]   ;;  %p1912_p1 = scmp.lt.s32.totalorder %s2355_s14, %s1910_s24 }
  0x26   : > { %1679 = vmatpush3.bf16.xpose.msra.mxu1 %v645_v9  ;;  %1750 = vmatprep.subr.msk.bf16.mxu0 %vm467_vm0, %v1833_v8  ;;  %vm752_vm9 = vcmp.lt.s32.totalorder %v736_v31, %v2172_v26  ;;  %vm751_vm10 = vcmp.lt.s32.totalorder %v735_v33, %v2172_v26  ;;  %vm760_vm11 = vcmp.lt.s32.totalorder %v736_v31, %v2180_v29  ;;  %v663_v61 = vsel %vm467_vm0, %v1844_v56, 0  ;;  %v1857_v8 = vld [vmem:[%s2166_s29 + $0x10] sm:$0xff]   ;;  %v1863_v14 = vld [vmem:[%s2166_s29 + $0x28] sm:$0xff]   ;;  %v1867_v20 = vld [vmem:[%s2166_s29 + $0x38] sm:$0xff]   ;;  %s1905_s16 = scalar_lea.vmem %s2355_s14, 2048 }
  0x27   : > { %1758 = vmatprep.subr.msk.bf16.mxu1 %vm467_vm0, %v1834_v10  ;;  %v768_v44 = vsel %vm752_vm9, 1, %v2017_v0  ;;  %v767_v48 = vsel %vm751_vm10, 1, %v2017_v0  ;;  %vm759_vm12 = vcmp.lt.s32.totalorder %v735_v33, %v2180_v29  ;;  %v776_v50 = vsel %vm760_vm11, 1, %v2017_v0  ;;  %v1858_v9 = vld [vmem:[%s2166_s29 + $0x50] sm:$0xff]   ;;  %v1859_v10 = vld [vmem:[%s2166_s29 + $0x18] sm:$0xff]   ;;  %p1906_p12 = scmp.ne.s32.totalorder %s2355_s14, %s1905_s16  ;;  %p1913_p2 = scmp.lt.s32.totalorder %s1911_s25, %s1905_s16 }
  0x28   : > { %789 = vperm.xlu1 %1828, %v766_v30   ;;  %783 = vperm.xlu0 %1827, %v764_v32   ;;  %vm754_vm13 = vcmp.lt.s32.totalorder %v738_v47, %v2172_v26  ;;  %v775_v51 = vsel %vm759_vm12, 1, %v2017_v0  ;;  %vm753_vm14 = vcmp.lt.s32.totalorder %v737_v49, %v2172_v26  ;;  %vm762_vm15 = vcmp.lt.s32.totalorder %v738_v47, %v2180_v29  ;;  %v1868_v21 = vld [vmem:[%s2166_s29 + $0x78] sm:$0xff]  }
  0x29   : > { %v770_v54 = vsel %vm754_vm13, 1, %v2017_v0  ;;  %v769_v57 = vsel %vm753_vm14, 1, %v2017_v0  ;;  %vm761_vm1 = vcmp.lt.s32.totalorder %v737_v49, %v2180_v29  ;;  %v778_v58 = vsel %vm762_vm15, 1, %v2017_v0  ;;  %p1907_p13 = pnand %p1906_p12, %p2092_p4  ;;  %p1914_p3 = por %p1913_p2, %p1912_p1 }
  0x2a   : > { %v777_v59 = vsel %vm761_vm1, 1, %v2017_v0  ;;  %v1851_v0 = vld [vmem:[%s2140_s15 + $0x18] sm:$0xff]   ;;  %s1339_s15 = scalar_lea.sflag [#allocation5], %s2321_s7 }
  0x2b   : > { %p1908_p0 = pneg %p1907_p13 }
  0x2c   : > { %807 = vperm.xlu1 %1828, %v772_v38   ;;  %804 = vperm.xlu0 %1827, %v771_v39  }
  0x2d   : > { %1657 = vmatpush3.bf16.xpose.msra.mxu0 %v487_v15  ;;  %v1864_v15 = vld [vmem:[%s2166_s29 + $0x68] sm:$0xff]   ;;  %p1915_p5 = pnand %p1914_p3, %p1908_p0 }
  0x2e   : > { %1681 = vmatpush3.bf16.xpose.msra.mxu1 %v648_v17  ;;  %1751 = vmatprep.subr.msk.bf16.mxu0 %vm467_vm0, %v1835_v12  ;;  %v1861_v12 = vld [vmem:[%s2166_s29 + $0x20] sm:$0xff]   ;;  %v1866_v17 = vld [vmem:[%s2166_s29 + $0x70] sm:$0xff]  }
  0x2f   : > { %1759 = vmatprep.subr.msk.bf16.mxu1 %vm467_vm0, %v1836_v13  ;;  %v1862_v13 = vld [vmem:[%s2166_s29 + $0x60] sm:$0xff]  }
  0x30   : > { %813 = vperm.xlu1 %1828, %v774_v40   ;;  %810 = vperm.xlu0 %1827, %v773_v41  }
  0x34   : > { %795 = vperm.xlu1 %1828, %v768_v44   ;;  %792 = vperm.xlu0 %1827, %v767_v48  }
  0x35   : > { %1659 = vmatpush3.bf16.xpose.msra.mxu0 %v490_v22 }
  0x36   : > { %1683 = vmatpush3.bf16.xpose.msra.mxu1 %v651_v24  ;;  %1752 = vmatprep.subr.msk.bf16.mxu0 %vm467_vm0, %v1837_v23 }
  0x37   : > { %1760 = vmatprep.subr.msk.bf16.mxu1 %vm467_vm0, %v1838_v25 }
  0x38   : > { %819 = vperm.xlu1 %1828, %v776_v50   ;;  %816 = vperm.xlu0 %1827, %v775_v51  }
  0x3c   : > { %801 = vperm.xlu1 %1828, %v770_v54   ;;  %798 = vperm.xlu0 %1827, %v769_v57  }
  0x3d   : > { %1661 = vmatpush3.bf16.xpose.msra.mxu0 %v493_v34 }
  0x3e   : > { %1685 = vmatpush3.bf16.xpose.msra.mxu1 %v654_v36  ;;  %1753 = vmatprep.subr.msk.bf16.mxu0 %vm467_vm0, %v1839_v35 }
  0x3f   : > { %1761 = vmatprep.subr.msk.bf16.mxu1 %vm467_vm0, %v1840_v37 }
  0x40   : > { %825 = vperm.xlu1 %1828, %v778_v58   ;;  %822 = vperm.xlu0 %1827, %v777_v59  }
  0x45   : > { %1663 = vmatpush3.bf16.xpose.msra.mxu0 %v496_v42 }
  0x46   : > { %1687 = vmatpush3.bf16.xpose.msra.mxu1 %v657_v45  ;;  %1754 = vmatprep.subr.msk.bf16.mxu0 %vm467_vm0, %v1841_v43 }
  0x47   : > { %1762 = vmatprep.subr.msk.bf16.mxu1 %vm467_vm0, %v1842_v46 }
  0x4d   : > { %1665 = vmatpush3.bf16.xpose.msra.mxu0 %v499_v52 }
  0x4e   : > { %1689 = vmatpush3.bf16.xpose.msra.mxu1 %v660_v55  ;;  %1755 = vmatprep.subr.msk.bf16.mxu0 %vm467_vm0, %v1843_v53 }
  0x4f   : > { %1763 = vmatprep.subr.msk.bf16.mxu1 %vm467_vm0, %v1844_v56 }
  0x55   : > { %1667 = vmatpush3.bf16.xpose.msra.mxu0 %v502_v60 }
  0x56   : > { %1691 = vmatpush3.bf16.xpose.msra.mxu1 %v663_v61  ;;  %1700 = vmatprep.subr.bf16.mxu0 %v1853_v4 }
  0x57   : > { %1724 = vmatprep.subr.bf16.mxu1 %v1854_v5 }
  0x5c   : > { %1669 = vmatmul.mubr.msk.bf16.vlgmr.msra.gmra.mrb[0].mxu0 %vm467_vm0, %v1847_v62 }
  0x5d   : > { %1693 = vmatmul.mubr.msk.bf16.vlgmr.msra.gmra.mrb[0].mxu1 %vm467_vm0, %v1848_v63  ;;  %1672 = vmatprep.mubr.msk.bf16.mxu0 %vm467_vm0, %v1849_v1 }
  0x5e   : > { %1696 = vmatprep.mubr.msk.bf16.mxu1 %vm467_vm0, %v1850_v2  ;;  %1701 = vmatpush3.bf16.msra.mxu0 %v1853_v4 }
  0x5f   : > { %1725 = vmatpush3.bf16.msra.mxu1 %v1854_v5  ;;  %1702 = vmatprep.subr.bf16.mxu0 %v1855_v6 }
  0x60   : > { %1726 = vmatprep.subr.bf16.mxu1 %v1856_v7 }
  0x62   : > { %1703 = vmatpush3.bf16.msra.mxu0 %v1855_v6 }
  0x63   : > { %1727 = vmatpush3.bf16.msra.mxu1 %v1856_v7  ;;  %1704 = vmatprep.subr.bf16.mxu0 %v1857_v8 }
  0x64   : > { %1673 = vmatmul.mubr.msk.bf16.gmra.mrb[4].mxu0 %vm467_vm0, %v1851_v0  ;;  %1728 = vmatprep.subr.bf16.mxu1 %v1858_v9 }
  0x65   : > { %1697 = vmatmul.mubr.msk.bf16.gmra.mrb[4].mxu1 %vm467_vm0, %v1852_v3 }
  0x66   : > { %1705 = vmatpush3.bf16.msra.mxu0 %v1857_v8 }
  0x67   : > { %1729 = vmatpush3.bf16.msra.mxu1 %v1858_v9  ;;  %1706 = vmatprep.subr.bf16.mxu0 %v1859_v10 }
  0x68   : > { %1730 = vmatprep.subr.bf16.mxu1 %v1860_v11 }
  0x6a   : > { %1707 = vmatpush3.bf16.msra.mxu0 %v1859_v10 }
  0x6b   : > { %1731 = vmatpush3.bf16.msra.mxu1 %v1860_v11  ;;  %1708 = vmatprep.subr.bf16.mxu0 %v1861_v12 }
  0x6c   : > { %1732 = vmatprep.subr.bf16.mxu1 %v1862_v13 }
  0x6e   : > { %1709 = vmatpush3.bf16.msra.mxu0 %v1861_v12 }
  0x6f   : > { %1733 = vmatpush3.bf16.msra.mxu1 %v1862_v13  ;;  %1710 = vmatprep.subr.bf16.mxu0 %v1863_v14 }
  0x70   : > { %1734 = vmatprep.subr.bf16.mxu1 %v1864_v15 }
  0x72   : > { %1711 = vmatpush3.bf16.msra.mxu0 %v1863_v14 }
  0x73   : > { %1735 = vmatpush3.bf16.msra.mxu1 %v1864_v15  ;;  %1712 = vmatprep.subr.bf16.mxu0 %v1865_v16 }
  0x74   : > { %1736 = vmatprep.subr.bf16.mxu1 %v1866_v17 }
  0x76   : > { %1713 = vmatpush3.bf16.msra.mxu0 %v1865_v16 }
  0x77   : > { %1737 = vmatpush3.bf16.msra.mxu1 %v1866_v17  ;;  %1714 = vmatprep.subr.bf16.mxu0 %v1867_v20 }
  0x78   : > { %1738 = vmatprep.subr.bf16.mxu1 %v1868_v21 }
  0x7a   : > { %1715 = vmatpush3.bf16.msra.mxu0 %v1867_v20 }
  0x7b   : > { %1739 = vmatpush3.bf16.msra.mxu1 %v1868_v21 }
  0xa3   : > { %v787_v18 = vpop.permute.xlu1 %786  ;;  %v781_v19 = vpop.permute.xlu0 %780 }
  0xa4   : > { %vm829_vm0 = vcmp.eq.s32.totalorder %v787_v18, 1  ;;  %vm827_vm2 = vcmp.eq.s32.totalorder %v781_v19, 1 }
  0xa7   : > { %v790_v22 = vpop.permute.xlu1 %789  ;;  %v784_v23 = vpop.permute.xlu0 %783 }
  0xa8   : > { %vm830_vm3 = vcmp.eq.s32.totalorder %v790_v22, 1  ;;  %vm828_vm4 = vcmp.eq.s32.totalorder %v784_v23, 1 }
  0xab   : > { %v808_v24 = vpop.permute.xlu1 %807  ;;  %v805_v25 = vpop.permute.xlu0 %804 }
  0xac   : > { %vm835_vm5 = vcmp.eq.s32.totalorder %v805_v25, 1  ;;  %vm836_vm8 = vcmp.eq.s32.totalorder %v808_v24, 1 }
  0xaf   : > { %v814_v26 = vpop.permute.xlu1 %813  ;;  %v811_v27 = vpop.permute.xlu0 %810 }
  0xb0   : > { %vm838_vm6 = vcmp.eq.s32.totalorder %v814_v26, 1  ;;  %vm837_vm7 = vcmp.eq.s32.totalorder %v811_v27, 1 }
  0xb3   : > { %v796_v28 = vpop.permute.xlu1 %795  ;;  %v793_v29 = vpop.permute.xlu0 %792 }
  0xb4   : > { %vm832_vm9 = vcmp.eq.s32.totalorder %v796_v28, 1  ;;  %vm831_vm10 = vcmp.eq.s32.totalorder %v793_v29, 1 }
  0xb7   : > { %v820_v30 = vpop.permute.xlu1 %819  ;;  %v817_v31 = vpop.permute.xlu0 %816 }
  0xb8   : > { %vm840_vm11 = vcmp.eq.s32.totalorder %v820_v30, 1  ;;  %vm839_vm12 = vcmp.eq.s32.totalorder %v817_v31, 1 }
  0xbb   : > { %v802_v32 = vpop.permute.xlu1 %801  ;;  %v799_v33 = vpop.permute.xlu0 %798 }
  0xbc   : > { %vm834_vm13 = vcmp.eq.s32.totalorder %v802_v32, 1  ;;  %vm833_vm14 = vcmp.eq.s32.totalorder %v799_v33, 1 }
  0xbf   : > { %v826_v54 = vpop.permute.xlu1 %825  ;;  %v823_v55 = vpop.permute.xlu0 %822 }
  0xc0   : > { %vm841_vm15 = vcmp.eq.s32.totalorder %v823_v55, 1  ;;  %vm842_vm1 = vcmp.eq.s32.totalorder %v826_v54, 1 }
 0x12f   : > { %v1670_v34 = vpop.f32.mrb[0].mxu0 }
 0x130   : > { %v2264_v35 = vsel %vm829_vm0, %v1670_v34, -1000000.0  ;;  %v1694_v36 = vpop.f32.mrb[0].mxu1  ;;  %v538_v37 = vpop.f32.mrb[1].mxu0 }
 0x131   : > { %v2266_v38 = vsel %vm837_vm7, %v1694_v36, -1000000.0  ;;  %v2268_v39 = vsel %vm827_vm2, %v538_v37, -1000000.0  ;;  %v699_v40 = vpop.f32.mrb[1].mxu1  ;;  %v1671_v41 = vpop.f32.mrb[2].mxu0 }
 0x132   : > { %v859_v42 = vmax.f32 %v2268_v39, %v2264_v35  ;;  %v2272_v43 = vsel %vm835_vm5, %v699_v40, -1000000.0  ;;  %v2275_v44 = vsel %vm830_vm3, %v1671_v41, -1000000.0  ;;  %v1695_v45 = vpop.f32.mrb[2].mxu1  ;;  %v541_v46 = vpop.f32.mrb[3].mxu0 }
 0x133   : > { %v872_v47 = vmax.f32 %v2272_v43, %v2266_v38  ;;  %v2280_v48 = vsel %vm838_vm6, %v1695_v45, -1000000.0  ;;  %v844_v49 = vsel %vm828_vm4, %v541_v46, -1000000.0  ;;  %v702_v50 = vpop.f32.mrb[3].mxu1 }
 0x134   : > { %v860_v51 = vmax.f32 %v844_v49, %v2275_v44  ;;  %v2284_v52 = vsel %vm836_vm8, %v702_v50, -1000000.0 }
 0x135   : > { %v873_v53 = vmax.f32 %v2284_v52, %v2280_v48 }
 0x137   : > { %v1674_v56 = vpop.f32.mrb[4].mxu0 }
 0x138   : > { %v1698_v57 = vpop.f32.mrb[4].mxu1  ;;  %v554_v58 = vpop.f32.mrb[5].mxu0  ;;  %v849_v0 = vsel %vm833_vm14, %v1674_v56, -1000000.0 }
 0x139   : > { %v847_v59 = vsel %vm831_vm10, %v554_v58, -1000000.0  ;;  %v715_v60 = vpop.f32.mrb[5].mxu1  ;;  %v1675_v61 = vpop.f32.mrb[6].mxu0  ;;  %v2292_v6 = vsel %vm841_vm15, %v1698_v57, -1000000.0 }
 0x13a   : > { %v861_v62 = vmax.f32 %v859_v42, %v847_v59  ;;  %v2288_v63 = vsel %vm839_vm12, %v715_v60, -1000000.0  ;;  %v1699_v1 = vpop.f32.mrb[6].mxu1  ;;  %v557_v2 = vpop.f32.mrb[7].mxu0  ;;  %v850_v11 = vsel %vm834_vm13, %v1675_v61, -1000000.0 }
 0x13b   : > { %v874_v3 = vmax.f32 %v872_v47, %v2288_v63  ;;  %v848_v4 = vsel %vm832_vm9, %v557_v2, -1000000.0  ;;  %v718_v5 = vpop.f32.mrb[7].mxu1  ;;  %v2300_v13 = vsel %vm842_vm1, %v1699_v1, -1000000.0 }
 0x13c   : > { %v863_v7 = vmax.f32 %v861_v62, %v849_v0  ;;  %v862_v8 = vmax.f32 %v860_v51, %v848_v4  ;;  %v2295_v9 = vsel %vm840_vm11, %v718_v5, -1000000.0 }
 0x13d   : > { %v876_v10 = vmax.f32 %v874_v3, %v2292_v6  ;;  %v875_v12 = vmax.f32 %v873_v53, %v2295_v9 }
 0x13e   : > { %v864_v14 = vmax.f32 %v862_v8, %v850_v11 }
 0x13f   : > { %v877_v15 = vmax.f32 %v875_v12, %v2300_v13 }
 0x140   : > { %v865_v16 = vmax.f32 %v863_v7, %v864_v14 }
 0x141   : > { %v878_v17 = vmax.f32 %v876_v10, %v877_v15 }
 0x142   : > { %v866_v18 = vrot.slane %v865_v16, 4 }
 0x143   : > { %v879_v19 = vrot.slane %v878_v17, 4 }
 0x144   : > { %v867_v20 = vmax.f32 %v865_v16, %v866_v18 }
 0x145   : > { %v880_v21 = vmax.f32 %v878_v17, %v879_v19 }
 0x146   : > { %v868_v22 = vrot.slane %v867_v20, 2 }
 0x147   : > { %v881_v23 = vrot.slane %v880_v21, 2 }
 0x148   : > { %v869_v24 = vmax.f32 %v867_v20, %v868_v22 }
 0x149   : > { %v882_v25 = vmax.f32 %v880_v21, %v881_v23 }
 0x14a   : > { %v870_v26 = vrot.slane %v869_v24, 1 }
 0x14b   : > { %v883_v27 = vrot.slane %v882_v25, 1 }
 0x14c   : > { %v871_v28 = vmax.f32 %v869_v24, %v870_v26 }
 0x14d   : > { %v884_v29 = vmax.f32 %v882_v25, %v883_v27 }
 0x14e   : > { %v885_v30 = vsub.f32 %v2268_v39, %v871_v28  ;;  %v886_v31 = vsub.f32 %v844_v49, %v871_v28  ;;  %v887_v32 = vsub.f32 %v2264_v35, %v871_v28  ;;  %v888_v33 = vsub.f32 %v2275_v44, %v871_v28 }
 0x14f   : > { %v889_v34 = vsub.f32 %v847_v59, %v871_v28  ;;  %v890_v36 = vsub.f32 %v848_v4, %v871_v28  ;;  %v891_v37 = vsub.f32 %v849_v0, %v871_v28  ;;  %v892_v40 = vsub.f32 %v850_v11, %v871_v28 }
 0x150   : > { %v901_v41 = vmul.f32 1.442695, %v885_v30  ;;  %v903_v42 = vmul.f32 1.442695, %v886_v31  ;;  %v893_v45 = vsub.f32 %v2272_v43, %v884_v29  ;;  %v905_v46 = vmul.f32 1.442695, %v887_v32 }
 0x151   : > { %v894_v47 = vsub.f32 %v2284_v52, %v884_v29  ;;  %v907_v50 = vmul.f32 1.442695, %v888_v33  ;;  %v895_v39 = vsub.f32 %v2266_v38, %v884_v29  ;;  %v896_v35 = vsub.f32 %v2280_v48, %v884_v29 }
 0x152   : > { %1869 = vpow2.f32 %v901_v41  ;;  %v897_v44 = vsub.f32 %v2288_v63, %v884_v29  ;;  %v898_v49 = vsub.f32 %v2295_v9, %v884_v29  ;;  %v909_v51 = vmul.f32 1.442695, %v889_v34 }
 0x153   : > { %1871 = vpow2.f32 %v903_v42  ;;  %v899_v53 = vsub.f32 %v2292_v6, %v884_v29  ;;  %v900_v54 = vsub.f32 %v2300_v13, %v884_v29  ;;  %v911_v43 = vmul.f32 1.442695, %v890_v36 }
 0x154   : > { %1873 = vpow2.f32 %v905_v46  ;;  %v917_v55 = vmul.f32 1.442695, %v893_v45  ;;  %v919_v52 = vmul.f32 1.442695, %v894_v47  ;;  %v913_v56 = vmul.f32 1.442695, %v891_v37 }
 0x155   : > { %1875 = vpow2.f32 %v907_v50  ;;  %v921_v38 = vmul.f32 1.442695, %v895_v39  ;;  %v915_v57 = vmul.f32 1.442695, %v892_v40  ;;  %v923_v48 = vmul.f32 1.442695, %v896_v35 }
 0x156   : > { %1877 = vpow2.f32 %v909_v51  ;;  %v925_v60 = vmul.f32 1.442695, %v897_v44  ;;  %v927_v63 = vmul.f32 1.442695, %v898_v49  ;;  %v929_v0 = vmul.f32 1.442695, %v899_v53 }
 0x157   : > { %1879 = vpow2.f32 %v911_v43  ;;  %v931_v6 = vmul.f32 1.442695, %v900_v54 }
 0x158   : > { %1881 = vpow2.f32 %v917_v55 }
 0x159   : > { %1883 = vpow2.f32 %v919_v52 }
 0x15a   : > { %1885 = vpow2.f32 %v913_v56 }
 0x15b   : > { %1887 = vpow2.f32 %v921_v38 }
 0x15c   : > { %v1870_v58 = vpop.eup %1869  ;;  %1889 = vpow2.f32 %v915_v57 }
 0x15d   : > { %v1872_v59 = vpop.eup %1871  ;;  %1891 = vpow2.f32 %v923_v48 }
 0x15e   : > { %v933_v61 = vadd.f32 %v1872_v59, %v1870_v58  ;;  %v1874_v62 = vpop.eup %1873  ;;  %1893 = vpow2.f32 %v925_v60 }
 0x15f   : > { %v1876_v2 = vpop.eup %1875  ;;  %1895 = vpow2.f32 %v927_v63 }
 0x160   : > { %v934_v1 = vadd.f32 %v1874_v62, %v933_v61  ;;  %v1878_v3 = vpop.eup %1877  ;;  %1897 = vpow2.f32 %v929_v0 }
 0x161   : > { %v1880_v5 = vpop.eup %1879  ;;  %1899 = vpow2.f32 %v931_v6 }
 0x162   : > { %v935_v4 = vadd.f32 %v1876_v2, %v934_v1  ;;  %v2314_v7 = vpop.eup %1881 }
 0x163   : > { %v2316_v9 = vpop.eup %1883 }
 0x164   : > { %v936_v8 = vadd.f32 %v1878_v3, %v935_v4  ;;  %v1886_v10 = vpop.eup %1885  ;;  %v946_v12 = vadd.f32 %v2316_v9, %v2314_v7 }
 0x165   : > { %v1888_v13 = vpop.eup %1887 }
 0x166   : > { %v937_v11 = vadd.f32 %v1880_v5, %v936_v8  ;;  %v1890_v14 = vpop.eup %1889  ;;  %v947_v16 = vadd.f32 %v1888_v13, %v946_v12 }
 0x167   : > { %v1892_v17 = vpop.eup %1891 }
 0x168   : > { %v938_v15 = vadd.f32 %v1886_v10, %v937_v11  ;;  %v948_v19 = vadd.f32 %v1892_v17, %v947_v16  ;;  %v1894_v20 = vpop.eup %1893 }
 0x169   : > { %v1896_v23 = vpop.eup %1895 }
 0x16a   : > { %v939_v18 = vadd.f32 %v1890_v14, %v938_v15  ;;  %v949_v22 = vadd.f32 %v1894_v20, %v948_v19  ;;  %v1898_v26 = vpop.eup %1897 }
 0x16b   : > { %v1900_v29 = vpop.eup %1899 }
 0x16c   : > { %v940_v21 = vrot.slane %v939_v18, 4  ;;  %v950_v25 = vadd.f32 %v1896_v23, %v949_v22 }
 0x16e   : > { %v941_v24 = vadd.f32 %v940_v21, %v939_v18  ;;  %v951_v28 = vadd.f32 %v1898_v26, %v950_v25 }
 0x170   : > { %v942_v27 = vrot.slane %v941_v24, 2  ;;  %v952_v31 = vadd.f32 %v1900_v29, %v951_v28 }
 0x172   : > { %v943_v30 = vadd.f32 %v942_v27, %v941_v24  ;;  %v953_v33 = vrot.slane %v952_v31, 4 }
 0x174   : > { %v944_v32 = vrot.slane %v943_v30, 1  ;;  %v954_v36 = vadd.f32 %v953_v33, %v952_v31 }
 0x176   : > { %v945_v34 = vadd.f32 %v944_v32, %v943_v30  ;;  %v955_v37 = vrot.slane %v954_v36, 2 }
 0x178   : > { %1901 = vrcp.f32 %v945_v34  ;;  %v956_v40 = vadd.f32 %v955_v37, %v954_v36 }
 0x17a   : > { %v957_v41 = vrot.slane %v956_v40, 1 }
 0x17c   : > { %v958_v42 = vadd.f32 %v957_v41, %v956_v40 }
 0x17e   : > { %1903 = vrcp.f32 %v958_v42 }
 0x182   : > { %v1902_v45 = vpop.eup %1901 }
 0x183   : > { %v961_v46 = vmul.f32 %v1902_v45, %v1870_v58  ;;  %v962_v47 = vmul.f32 %v1902_v45, %v1872_v59  ;;  %v963_v50 = vmul.f32 %v1902_v45, %v1874_v62  ;;  %v964_v39 = vmul.f32 %v1902_v45, %v1876_v2 }
 0x184   : > { %v965_v35 = vmul.f32 %v1902_v45, %v1878_v3  ;;  %v966_v44 = vmul.f32 %v1902_v45, %v1880_v5  ;;  %v967_v49 = vmul.f32 %v1902_v45, %v1886_v10  ;;  %v968_v51 = vmul.f32 %v1902_v45, %v1890_v14 }
 0x185   : > { %977 = vst [vmem:[%s2326_s9] sm:$0xff] %v961_v46  ;;  %978 = vst [vmem:[%s2326_s9 + $0x8] sm:$0xff] %v962_v47  ;;  %v993_v53 = vpack.c.bf16 %v962_v47, %v961_v46  ;;  %v994_v54 = vpack.c.bf16 %v964_v39, %v963_v50 }
 0x186   : > { %979 = vst [vmem:[%s2326_s9 + $0x10] sm:$0xff] %v963_v50  ;;  %980 = vst [vmem:[%s2326_s9 + $0x18] sm:$0xff] %v964_v39  ;;  %v995_v43 = vpack.c.bf16 %v966_v44, %v965_v35  ;;  %v996_v55 = vpack.c.bf16 %v968_v51, %v967_v49 }
 0x187   : > { %981 = vst [vmem:[%s2326_s9 + $0x20] sm:$0xff] %v965_v35  ;;  %982 = vst [vmem:[%s2326_s9 + $0x28] sm:$0xff] %v966_v44  ;;  %1716 = vmatprep.mubr.bf16.mxu0 %v993_v53 }
 0x188   : > { %983 = vst [vmem:[%s2326_s9 + $0x30] sm:$0xff] %v967_v49  ;;  %984 = vst [vmem:[%s2326_s9 + $0x38] sm:$0xff] %v968_v51  ;;  %1717 = vmatmul.mubr.bf16.vlgmr.msra.gmra.mrb[8].mxu0 %v994_v54  ;;  %v1904_v52 = vpop.eup %1903 }
 0x189   : > { %1720 = vmatprep.mubr.bf16.mxu0 %v995_v43  ;;  %v969_v56 = vmul.f32 %v1904_v52, %v2314_v7  ;;  %v970_v38 = vmul.f32 %v1904_v52, %v2316_v9  ;;  %v971_v57 = vmul.f32 %v1904_v52, %v1888_v13  ;;  %v972_v48 = vmul.f32 %v1904_v52, %v1892_v17 }
 0x18a   : > { %v973_v58 = vmul.f32 %v1904_v52, %v1894_v20  ;;  %v974_v59 = vmul.f32 %v1904_v52, %v1896_v23  ;;  %v975_v60 = vmul.f32 %v1904_v52, %v1898_v26  ;;  %v976_v61 = vmul.f32 %v1904_v52, %v1900_v29 }
 0x18b   : > { %985 = vst [vmem:[%s2326_s9 + $0x40] sm:$0xff] %v969_v56  ;;  %986 = vst [vmem:[%s2326_s9 + $0x48] sm:$0xff] %v970_v38  ;;  %v997_v62 = vpack.c.bf16 %v970_v38, %v969_v56  ;;  %v998_v63 = vpack.c.bf16 %v972_v48, %v971_v57 }
 0x18c   : > { %987 = vst [vmem:[%s2326_s9 + $0x50] sm:$0xff] %v971_v57  ;;  %988 = vst [vmem:[%s2326_s9 + $0x58] sm:$0xff] %v972_v48  ;;  %v999_v1 = vpack.c.bf16 %v974_v59, %v973_v58  ;;  %v1000_v2 = vpack.c.bf16 %v976_v61, %v975_v60 }
 0x18d   : > { %989 = vst [vmem:[%s2326_s9 + $0x60] sm:$0xff] %v973_v58  ;;  %990 = vst [vmem:[%s2326_s9 + $0x68] sm:$0xff] %v974_v59  ;;  %1740 = vmatprep.mubr.bf16.mxu1 %v997_v62 }
 0x18e   : > { %991 = vst [vmem:[%s2326_s9 + $0x70] sm:$0xff] %v975_v60  ;;  %992 = vst [vmem:[%s2326_s9 + $0x78] sm:$0xff] %v976_v61  ;;  %1741 = vmatmul.mubr.bf16.vlgmr.msra.gmra.mrb[8].mxu1 %v998_v63 }
 0x18f   : > { %1744 = vmatprep.mubr.bf16.mxu1 %v999_v1 }
 0x190   : > { %1721 = vmatmul.mubr.bf16.gmra.mrb[12].mxu0 %v996_v55 }
 0x196   : > { %1745 = vmatmul.mubr.bf16.gmra.mrb[12].mxu1 %v1000_v2 }
 0x197   : > { %1918 = shalt.err (!%p1915_p5)
}
 0x198   : > { %s1919_s27 = scalar_lea.hbm %s2352_s13, 2048  ;;  %s1923_s11 = scalar_lea.hbm %s2484_s5, 4096 }
 0x199   : > { %p1920_p6 = scmp.ne.s32.totalorder %s2352_s13, %s1919_s27  ;;  %p1924_p10 = scmp.lt.u32.totalorder %s2352_s13, %s2484_s5 }
 0x19a   : > { %p1925_p11 = scmp.lt.u32.totalorder %s1923_s11, %s1919_s27  ;;  %p1927_p13 = scmp.lt.u32.totalorder %s1919_s27, %s2352_s13 }
 0x19b   : > { %p1921_p7 = pnand %p1920_p6, %p2092_p4 }
 0x19c   : > { %p1926_p12 = por %p1925_p11, %p1924_p10 }
 0x19d   : > { %p1922_p9 = pneg %p1921_p7 }
 0x19e   : > { %p1928_p0 = por %p1927_p13, %p1926_p12 }
 0x1a0   : > { %p1929_p1 = pnand %p1928_p0, %p1922_p9 }
 0x1a2   : > { %1932 = shalt.err (!%p1929_p1)
}
 0x1a3   : > { %s2019_s16 = smov 128   ;;  %s2020_s24 = smov 8   ;;  %vm1263_vm0 = vcmask 523264  }
 0x1a4   : > { %1765 = dma.vmem_to_hbm [thread:$0]  (%p2092_p4), %s2355_s14, 2048, %s2352_s13, %s1339_s15, %s2019_s16, %s2019_s16, %s2020_s24  }
 0x1a5   : > { %s2386_s25 = scalar_lea.vmem [#allocation2], %s1525_s8  ;;  %s2422_s15 = scalar_lea.hbm %s2483_s4, %s1601_s10 }
 0x1a6   : > { %s1353_s8 = sshll.u32 %s2386_s25, 4  ;;  %s1334_s27 = scalar_lea.sflag [#allocation3], %s2321_s7  ;;  %s2424_s8 = int_to_ptr.vmem [resolvable:$true] %s1353_s8 }
 0x1a7   : > { %s1933_s29 = scalar_lea.vmem %s2424_s8, 2048  ;;  %s2021_s21 = smov [#allocation2]  }
 0x1a8   : > { %p1934_p2 = scmp.ne.s32.totalorder %s2424_s8, %s1933_s29  ;;  %s1937_s9 = sshll.u32 %s2021_s21, 4  ;;  %s1938_s9 = int_to_ptr.vmem [resolvable:$false] %s1937_s9 }
 0x1a9   : > { %s1939_s10 = scalar_lea.vmem %s1938_s9, 4096  ;;  %p1940_p6 = scmp.lt.s32.totalorder %s2424_s8, %s1938_s9 }
 0x1aa   : > { %p1935_p3 = pnand %p1934_p2, %p2092_p4  ;;  %p1941_p7 = scmp.lt.s32.totalorder %s1939_s10, %s1933_s29 }
 0x1ac   : > { %p1936_p5 = pneg %p1935_p3  ;;  %p1942_p9 = por %p1941_p7, %p1940_p6 }
 0x1ae   : > { %p1943_p10 = pnand %p1942_p9, %p1936_p5 }
 0x25b   : > { %v1718_v0 = vpop.f32.mrb[8].mxu0 }
 0x25c   : > { %1266 = vst.msk [vmem:[%s2386_s25 + $0x10] sm:$0xff] %vm1263_vm0, %v1718_v0  ;;  %v1115_v3 = vpop.f32.mrb[9].mxu0 }
 0x25d   : > { %1264 = vst.msk [vmem:[%s2386_s25] sm:$0xff] %vm1263_vm0, %v1115_v3  ;;  %v1719_v4 = vpop.f32.mrb[10].mxu0 }
 0x25e   : > { %1267 = vst.msk [vmem:[%s2386_s25 + $0x18] sm:$0xff] %vm1263_vm0, %v1719_v4  ;;  %v1118_v5 = vpop.f32.mrb[11].mxu0 }
 0x25f   : > { %1265 = vst.msk [vmem:[%s2386_s25 + $0x8] sm:$0xff] %vm1263_vm0, %v1118_v5 }
 0x261   : > { %v1742_v6 = vpop.f32.mrb[8].mxu1 }
 0x262   : > { %1274 = vst.msk [vmem:[%s2386_s25 + $0x50] sm:$0xff] %vm1263_vm0, %v1742_v6  ;;  %v1228_v8 = vpop.f32.mrb[9].mxu1 }
 0x263   : > { %v1722_v7 = vpop.f32.mrb[12].mxu0  ;;  %1272 = vst.msk [vmem:[%s2386_s25 + $0x40] sm:$0xff] %vm1263_vm0, %v1228_v8  ;;  %v1743_v10 = vpop.f32.mrb[10].mxu1 }
 0x264   : > { %1270 = vst.msk [vmem:[%s2386_s25 + $0x30] sm:$0xff] %vm1263_vm0, %v1722_v7  ;;  %v1131_v9 = vpop.f32.mrb[13].mxu0  ;;  %1275 = vst.msk [vmem:[%s2386_s25 + $0x58] sm:$0xff] %vm1263_vm0, %v1743_v10  ;;  %v1231_v12 = vpop.f32.mrb[11].mxu1 }
 0x265   : > { %1268 = vst.msk [vmem:[%s2386_s25 + $0x20] sm:$0xff] %vm1263_vm0, %v1131_v9  ;;  %v1723_v11 = vpop.f32.mrb[14].mxu0  ;;  %1273 = vst.msk [vmem:[%s2386_s25 + $0x48] sm:$0xff] %vm1263_vm0, %v1231_v12 }
 0x266   : > { %1271 = vst.msk [vmem:[%s2386_s25 + $0x38] sm:$0xff] %vm1263_vm0, %v1723_v11  ;;  %v1134_v13 = vpop.f32.mrb[15].mxu0 }
 0x267   : > { %1269 = vst.msk [vmem:[%s2386_s25 + $0x28] sm:$0xff] %vm1263_vm0, %v1134_v13 }
 0x269   : > { %v1746_v14 = vpop.f32.mrb[12].mxu1 }
 0x26a   : > { %1278 = vst.msk [vmem:[%s2386_s25 + $0x70] sm:$0xff] %vm1263_vm0, %v1746_v14  ;;  %v1244_v15 = vpop.f32.mrb[13].mxu1 }
 0x26b   : > { %1276 = vst.msk [vmem:[%s2386_s25 + $0x60] sm:$0xff] %vm1263_vm0, %v1244_v15  ;;  %v1747_v16 = vpop.f32.mrb[14].mxu1 }
 0x26c   : > { %1279 = vst.msk [vmem:[%s2386_s25 + $0x78] sm:$0xff] %vm1263_vm0, %v1747_v16  ;;  %v1247_v17 = vpop.f32.mrb[15].mxu1 }
 0x26d   : > { %1277 = vst.msk [vmem:[%s2386_s25 + $0x68] sm:$0xff] %vm1263_vm0, %v1247_v17 }
 0x26e   : > { %1946 = shalt.err (!%p1943_p10)
}
 0x26f   : > { %s1947_s11 = scalar_lea.hbm %s2422_s15, 2048  ;;  %s1951_s25 = scalar_lea.hbm %s2483_s4, 4096 }
 0x270   : > { %p1948_p11 = scmp.ne.s32.totalorder %s2422_s15, %s1947_s11  ;;  %p1952_p0 = scmp.lt.u32.totalorder %s2422_s15, %s2483_s4 }
 0x271   : > { %p1953_p1 = scmp.lt.u32.totalorder %s1951_s25, %s1947_s11  ;;  %p1955_p3 = scmp.lt.u32.totalorder %s1947_s11, %s2422_s15 }
 0x272   : > { %p1949_p12 = pnand %p1948_p11, %p2092_p4 }
 0x273   : > { %p1954_p2 = por %p1953_p1, %p1952_p0 }
 0x274   : > { %p1950_p13 = pneg %p1949_p12 }
 0x275   : > { %p1956_p5 = por %p1955_p3, %p1954_p2 }
 0x277   : > { %p1957_p6 = pnand %p1956_p5, %p1950_p13 }
 0x279   : > { %1960 = shalt.err (!%p1957_p6)
}
 0x27a   : > { %1764 = dma.vmem_to_hbm [thread:$0]  (%p2092_p4), %s2424_s8, 2048, %s2422_s15, %s1334_s27, %s2019_s16, %s2019_s16, %s2020_s24  }
 0x27b PF: > { %p1775_p7 = scmp.ge.s32.totalorder %s2015_s23, 2  ;;  %s1386_s29 = sand.u32 1, %s1995_s18  }
 0x27c   : > { %s1387_s21 = scalar_lea.sflag [#allocation3], %s1386_s29 }
 0x27d   : > { %p1769_p9 = pnand %p1775_p7, %p2099_p8 }
 0x27f   : > { %1986 = dma.done.wait (!%p1769_p9), %s1387_s21, 2048  }
 0x280   : > { %1988 = vsyncadd (!%p1769_p9), %s1387_s21, 4294965248  ;;  %s1396_s28 = scalar_lea.sflag [#allocation5], %s1386_s29 }
 0x281   : > { %1990 = dma.done.wait (!%p1769_p9), %s1396_s28, 2048  }
 0x282   : > { %1992 = vsyncadd (!%p1769_p9), %s1396_s28, 4294965248  ;;  %s22_s23 = sadd.s32 1, %s2015_s23   ;;  %s2487_s18 = smov %s1999_s19 }
 0x283   : > { %p19_p10 = scmp.ge.s32.totalorder %s22_s23, 4   ;;  %s2488_s19 = smov %s2003_s20 }
 0x284   : > { %s2489_s20 = smov %s2105_s6  ;;  %s2490_s21 = smov %s2011_s22 }
 0x285   : > { %s2491_s22 = smov %s2493_s26  ;;  %21 = sbr.rel (!%p19_p10) target bundleno = 6 (0x6), region = 105 }
 0x28c   :  { %1401 = vsyncpa [#allocation3], 1 }
 0x28d   :  { %1403 = vsyncpa [#allocation3 + $0x1], 1 }
 0x28e   :  { %1404 = vsyncpa [#allocation5], 1 }
 0x28f   :  { %1406 = vsyncpa [#allocation5 + $0x1], 1 }

</bundles_post_ra>
